<compile_context>
chip_gen: v7x
topology: tpu7x:2x2x1
jax: 0.10.0
libtpu: 0.0.40
codegen_flags: <defaults>
</compile_context>

<pallas_src>
import functools

import jax
import jax.numpy as jnp
from jax import lax
from jax.experimental import pallas as pl
from jax.experimental.pallas import tpu as pltpu

LANES = 128
SUBLANES = 8
MIN_BLOCK = SUBLANES * LANES  # 1024


def _adjusted_bce_kernel(out_ref, tgt_ref, mask_ref, psum_ref, acc_ref, *,
                         lambda_, gamma, binary_target):
    j = pl.program_id(1)  # reduction axis within the chunk

    @pl.when(j == 0)
    def _():
        acc_ref[...] = jnp.zeros_like(acc_ref)

    # Cast narrow/native input dtypes to f32 on-chip (no wrapper-side HBM copies).
    o = out_ref[...].astype(jnp.float32)
    t = tgt_ref[...].astype(jnp.float32)
    m = mask_ref[...].astype(jnp.float32)

    # PyTorch binary_cross_entropy clamps the log terms at -100.
    if binary_target:
        # Valid only for t in {0,1}: one log instead of two (halves EUP work).
        bce = -jnp.maximum(jnp.log(t * o + (1.0 - t) * (1.0 - o)), -100.0)
    else:
        log_o = jnp.maximum(jnp.log(o), -100.0)
        log_1mo = jnp.maximum(jnp.log(1.0 - o), -100.0)
        bce = -(t * log_o + (1.0 - t) * log_1mo)

    # lambda*m*dp*bce + (1-m)*dp*bce == dp*bce*(1 + (lambda-1)*m)
    # gamma is a static non-negative Python int -> integer_pow lowers to multiplies.
    if gamma == 0:
        adjusted = bce * (1.0 + (lambda_ - 1.0) * m)
    else:
        adjusted = lax.integer_pow(o - t, gamma) * bce * (1.0 + (lambda_ - 1.0) * m)

    # Pure-VALU tree accumulation into an (8,128) vreg-shaped accumulator.
    rt = adjusted.shape[0]
    acc_ref[...] += jnp.sum(
        adjusted.reshape(rt // SUBLANES, SUBLANES, LANES), axis=0)

    @pl.when(j == pl.num_programs(1) - 1)
    def _():
        psum_ref[...] = jnp.sum(acc_ref[...], axis=0, keepdims=True)


def _adjusted_sum_plain(o, t, m, lambda_, gamma, binary_target):
    """Plain-JAX sum of the adjusted loss (used only for the <=1023-element tail)."""
    o = o.astype(jnp.float32)
    t = t.astype(jnp.float32)
    m = m.astype(jnp.float32)
    if binary_target:
        bce = -jnp.maximum(jnp.log(t * o + (1.0 - t) * (1.0 - o)), -100.0)
    else:
        bce = -(t * jnp.maximum(jnp.log(o), -100.0)
                + (1.0 - t) * jnp.maximum(jnp.log(1.0 - o), -100.0))
    if gamma == 0:
        adj = bce * (1.0 + (lambda_ - 1.0) * m)
    else:
        adj = lax.integer_pow(o - t, gamma) * bce * (1.0 + (lambda_ - 1.0) * m)
    return jnp.sum(adj)


def _pick_row_tile(rows, row_tile):
    """Largest multiple of 8, <= row_tile, that exactly divides `rows`."""
    cap = min(row_tile, rows)
    cap -= cap % SUBLANES
    cap = max(cap, SUBLANES)
    for cand in range(cap, SUBLANES - 1, -SUBLANES):
        if rows % cand == 0:
            return cand
    return SUBLANES  # rows is always a multiple of 8


def _pick_chunks(total_blocks, max_chunks):
    """Divisor of total_blocks, <= max_chunks, preferring even (v7x 2-TC balance)."""
    cap = max(1, min(max_chunks, total_blocks))
    divs = [d for d in range(1, cap + 1) if total_blocks % d == 0]
    even = [d for d in divs if d % 2 == 0]
    return max(even) if even else max(divs)


def adjusted_bce_loss(output, target, mask, *, lambda_=5, gamma=2,
                      row_tile=4096, max_chunks=8, binary_target=False):
    """Mean adjusted BCE loss via a Pallas TPU kernel.

    row_tile rows * 128 lanes * itemsize = bytes per input block per step. Default
    4096 (f32: 2 MiB/input, 12 MiB double-buffered) fits every generation's default
    scoped VMEM; use 8192 on v6e/v7x (vmem_limit_bytes is raised automatically).
    For lowest HBM traffic keep target/mask in narrow dtypes (bf16 / int8 / bool) at
    the call site; the kernel upcasts on-chip. Set binary_target=True only if target
    is known to be {0,1} (halves the transcendental work).
    """
    assert isinstance(gamma, int) and gamma >= 0, "gamma must be a non-negative int"
    assert output.shape == target.shape == mask.shape
    row_tile = int(row_tile)
    assert row_tile >= SUBLANES, "row_tile must be >= 8"

    lambda_f = float(lambda_)
    n_elems = int(output.size)
    flat_o = output.reshape(-1)
    flat_t = target.reshape(-1)
    flat_m = mask.reshape(-1)

    # Largest multiple-of-(8*128) prefix goes through the kernel; the tiny remainder
    # (<= 1023 elements) is handled in plain JAX.  No padding, no in-kernel masking.
    main = (n_elems // MIN_BLOCK) * MIN_BLOCK
    tail = n_elems - main

    total = jnp.float32(0.0)

    if main:
        rows = main // LANES  # multiple of 8
        if tail:
            o2 = flat_o[:main].reshape(rows, LANES)
            t2 = flat_t[:main].reshape(rows, LANES)
            m2 = flat_m[:main].reshape(rows, LANES)
        else:  # common aligned case: pure reshape, zero extra HBM traffic
            o2 = flat_o.reshape(rows, LANES)
            t2 = flat_t.reshape(rows, LANES)
            m2 = flat_m.reshape(rows, LANES)

        row_tile_eff = _pick_row_tile(rows, row_tile)
        total_blocks = rows // row_tile_eff                      # exact
        n_chunks = _pick_chunks(total_blocks, int(max_chunks))   # exact divisor
        steps_per_chunk = total_blocks // n_chunks               # exact

        kernel = functools.partial(
            _adjusted_bce_kernel,
            lambda_=lambda_f,
            gamma=gamma,
            binary_target=bool(binary_target),
        )

        in_map = lambda c, j: (c * steps_per_chunk + j, 0)
        in_spec = pl.BlockSpec((row_tile_eff, LANES), in_map)

        # Raise the scoped-VMEM limit only when the double-buffered tiles need it
        # (e.g. row_tile=8192 on v6e/v7x); default 4096 fits every generation.
        in_bytes_per_row = LANES * (o2.dtype.itemsize + t2.dtype.itemsize
                                    + m2.dtype.itemsize)
        vmem_needed = 2 * row_tile_eff * in_bytes_per_row + (1 << 20)
        cp_kwargs = {"dimension_semantics": ("parallel", "arbitrary")}
        if vmem_needed > (16 << 20):
            cp_kwargs["vmem_limit_bytes"] = int(vmem_needed)

        partials = pl.pallas_call(
            kernel,
            out_shape=jax.ShapeDtypeStruct((n_chunks, LANES), jnp.float32),
            grid_spec=pltpu.PrefetchScalarGridSpec(
                num_scalar_prefetch=0,
                grid=(n_chunks, steps_per_chunk),
                in_specs=[in_spec, in_spec, in_spec],
                out_specs=pl.BlockSpec((1, LANES), lambda c, j: (c, 0)),
                scratch_shapes=[pltpu.VMEM((SUBLANES, LANES), jnp.float32)],
            ),
            compiler_params=pltpu.CompilerParams(**cp_kwargs),
        )(o2, t2, m2)
        total = total + jnp.sum(partials)

    if tail:
        total = total + _adjusted_sum_plain(
            flat_o[main:], flat_t[main:], flat_m[main:],
            lambda_f, gamma, bool(binary_target))

    return total / jnp.float32(n_elems)


def _reference(output, target, mask, lambda_=5, gamma=2):
    o = output.astype(jnp.float32)
    t = target.astype(jnp.float32)
    m = mask.astype(jnp.float32)
    bce = -(t * jnp.maximum(jnp.log(o), -100.0)
            + (1.0 - t) * jnp.maximum(jnp.log(1.0 - o), -100.0))
    dp = (o - t) ** gamma
    adj = lambda_ * m * dp * bce + (1.0 - m) * dp * bce
    return jnp.mean(adj)


if __name__ == "__main__":
    key = jax.random.PRNGKey(0)
    k1, k2, k3 = jax.random.split(key, 3)

    B, C, H, W = 2, 4, 16, 16  # NCHW
    # `output` must be a probability in (0, 1) (post-sigmoid), `target` in [0, 1],
    # `mask` binary.
    output = jax.nn.sigmoid(jax.random.normal(k1, (B, C, H, W), jnp.float32))
    target = (jax.random.uniform(k2, (B, C, H, W)) > 0.5).astype(jnp.float32)
    mask = (jax.random.uniform(k3, (B, C, H, W)) > 0.5).astype(jnp.float32)

    loss = adjusted_bce_loss(output, target, mask, lambda_=5, gamma=2)
    loss = jax.block_until_ready(loss)
    ref = _reference(output, target, mask, lambda_=5, gamma=2)
    assert jnp.allclose(loss, ref, rtol=1e-5, atol=1e-6), (loss, ref)

    # Unaligned element count: exercises the prefix-kernel + plain-JAX tail path.
    shape_u = (3, 5, 7, 11)  # 1155 elements -> 1024 through the kernel + 131 tail
    k4, k5, k6 = jax.random.split(jax.random.PRNGKey(1), 3)
    out_u = jax.nn.sigmoid(jax.random.normal(k4, shape_u, jnp.float32))
    tgt_u = (jax.random.uniform(k5, shape_u) > 0.5).astype(jnp.float32)
    msk_u = (jax.random.uniform(k6, shape_u) > 0.5).astype(jnp.float32)
    loss_u = jax.block_until_ready(adjusted_bce_loss(out_u, tgt_u, msk_u))
    ref_u = _reference(out_u, tgt_u, msk_u)
    assert jnp.allclose(loss_u, ref_u, rtol=1e-5, atol=1e-6), (loss_u, ref_u)

    print("KERNEL_OK")
</pallas_src>

<mosaic_0001>
module attributes {stable_mosaic.version = 11 : i64} {
  func.func @_adjusted_bce_kernel(%arg0: i32, %arg1: i32, %arg2: memref<16x128xf32, #tpu.memory_space<vmem>>, %arg3: memref<16x128xf32, #tpu.memory_space<vmem>>, %arg4: memref<16x128xf32, #tpu.memory_space<vmem>>, %arg5: memref<1x128xf32, #tpu.memory_space<vmem>>, %arg6: memref<8x128xf32, #tpu.memory_space<vmem>>) attributes {dimension_semantics = [#tpu.dimension_semantics<parallel>, #tpu.dimension_semantics<arbitrary>], iteration_bounds = array<i64: 1, 1>, scalar_prefetch = 0 : i64, scratch_operands = 1 : i64, tpu.core_type = #tpu.core_type<tc>, window_params = [{transform_indices = @transform_0, window_bounds = array<i64: 16, 128>}, {transform_indices = @transform_1, window_bounds = array<i64: 16, 128>}, {transform_indices = @transform_2, window_bounds = array<i64: 16, 128>}, {transform_indices = @transform_3, window_bounds = array<i64: 1, 128>}]} {
    %c0_i32 = arith.constant 0 : i32
    %0 = arith.cmpi eq, %arg1, %c0_i32 : i32
    %1 = arith.extui %0 : i1 to i32
    %c0_i32_0 = arith.constant 0 : i32
    %2 = arith.cmpi ne, %1, %c0_i32_0 : i32
    scf.if %2 {
      %cst_19 = arith.constant 0.000000e+00 : f32
      %37 = vector.broadcast %cst_19 : f32 to vector<8x128xf32>
      %c0_20 = arith.constant 0 : index
      %c0_21 = arith.constant 0 : index
      %38 = vector.load %arg6[%c0_20, %c0_21] : memref<8x128xf32, #tpu.memory_space<vmem>>, vector<8x128xf32>
      tpu.vector_store %arg6[%c0_20, %c0_21], %37 {strides = array<i32>} : memref<8x128xf32, #tpu.memory_space<vmem>>, vector<8x128xf32>,
    } else {
    }
    %c0 = arith.constant 0 : index
    %c0_1 = arith.constant 0 : index
    %3 = vector.load %arg2[%c0, %c0_1] : memref<16x128xf32, #tpu.memory_space<vmem>>, vector<16x128xf32>
    %c0_2 = arith.constant 0 : index
    %c0_3 = arith.constant 0 : index
    %4 = vector.load %arg3[%c0_2, %c0_3] : memref<16x128xf32, #tpu.memory_space<vmem>>, vector<16x128xf32>
    %c0_4 = arith.constant 0 : index
    %c0_5 = arith.constant 0 : index
    %5 = vector.load %arg4[%c0_4, %c0_5] : memref<16x128xf32, #tpu.memory_space<vmem>>, vector<16x128xf32>
    %6 = math.log %3 : vector<16x128xf32>
    %cst = arith.constant -1.000000e+02 : f32
    %7 = vector.broadcast %cst : f32 to vector<16x128xf32>
    %8 = arith.maximumf %6, %7 : vector<16x128xf32>
    %cst_6 = arith.constant 1.000000e+00 : f32
    %9 = vector.broadcast %cst_6 : f32 to vector<16x128xf32>
    %10 = arith.subf %9, %3 : vector<16x128xf32>
    %11 = math.log %10 : vector<16x128xf32>
    %cst_7 = arith.constant -1.000000e+02 : f32
    %12 = vector.broadcast %cst_7 : f32 to vector<16x128xf32>
    %13 = arith.maximumf %11, %12 : vector<16x128xf32>
    %14 = arith.mulf %4, %8 : vector<16x128xf32>
    %cst_8 = arith.constant 1.000000e+00 : f32
    %15 = vector.broadcast %cst_8 : f32 to vector<16x128xf32>
    %16 = arith.subf %15, %4 : vector<16x128xf32>
    %17 = arith.mulf %16, %13 : vector<16x128xf32>
    %18 = arith.addf %14, %17 : vector<16x128xf32>
    %cst_9 = arith.constant 0.000000e+00 : f32
    %19 = vector.broadcast %cst_9 : f32 to vector<16x128xf32>
    %20 = arith.subf %19, %18 : vector<16x128xf32>
    %21 = arith.subf %3, %4 : vector<16x128xf32>
    %22 = arith.mulf %21, %21 : vector<16x128xf32>
    %23 = arith.mulf %22, %20 : vector<16x128xf32>
    %cst_10 = arith.constant 4.000000e+00 : f32
    %24 = vector.broadcast %cst_10 : f32 to vector<16x128xf32>
    %25 = arith.mulf %24, %5 : vector<16x128xf32>
    %cst_11 = arith.constant 1.000000e+00 : f32
    %26 = vector.broadcast %cst_11 : f32 to vector<16x128xf32>
    %27 = arith.addf %26, %25 : vector<16x128xf32>
    %28 = arith.mulf %23, %27 : vector<16x128xf32>
    %c0_12 = arith.constant 0 : index
    %c0_13 = arith.constant 0 : index
    %29 = vector.load %arg6[%c0_12, %c0_13] : memref<8x128xf32, #tpu.memory_space<vmem>>, vector<8x128xf32>
    %30 = vector.shape_cast %28 : vector<16x128xf32> to vector<2x8x128xf32>
    %cst_14 = arith.constant dense<0.000000e+00> : vector<8x128xf32>
    %31 = vector.multi_reduction <add>, %30, %cst_14 [0] : vector<2x8x128xf32> to vector<8x128xf32>
    %32 = arith.addf %29, %31 : vector<8x128xf32>
    %c0_15 = arith.constant 0 : index
    %c0_16 = arith.constant 0 : index
    %33 = vector.load %arg6[%c0_15, %c0_16] : memref<8x128xf32, #tpu.memory_space<vmem>>, vector<8x128xf32>
    tpu.vector_store %arg6[%c0_15, %c0_16], %32 {strides = array<i32>} : memref<8x128xf32, #tpu.memory_space<vmem>>, vector<8x128xf32>,
    %c0_i32_17 = arith.constant 0 : i32
    %34 = arith.cmpi eq, %arg1, %c0_i32_17 : i32
    %35 = arith.extui %34 : i1 to i32
    %c0_i32_18 = arith.constant 0 : i32
    %36 = arith.cmpi ne, %35, %c0_i32_18 : i32
    scf.if %36 {
      %c0_19 = arith.constant 0 : index
      %c0_20 = arith.constant 0 : index
      %37 = vector.load %arg6[%c0_19, %c0_20] : memref<8x128xf32, #tpu.memory_space<vmem>>, vector<8x128xf32>
      %cst_21 = arith.constant dense<0.000000e+00> : vector<128xf32>
      %38 = vector.multi_reduction <add>, %37, %cst_21 [0] : vector<8x128xf32> to vector<128xf32>
      %39 = vector.shape_cast %38 : vector<128xf32> to vector<1x128xf32>
      %c0_22 = arith.constant 0 : index
      %c0_23 = arith.constant 0 : index
      %40 = vector.load %arg5[%c0_22, %c0_23] : memref<1x128xf32, #tpu.memory_space<vmem>>, vector<1x128xf32>
      tpu.vector_store %arg5[%c0_22, %c0_23], %39 {strides = array<i32>} : memref<1x128xf32, #tpu.memory_space<vmem>>, vector<1x128xf32>,
    } else {
    }
    return
  }
  func.func @transform_0(%arg0: i32, %arg1: i32) -> (i32, i32) {
    %c1_i32 = arith.constant 1 : i32
    %0 = arith.muli %arg0, %c1_i32 : i32
    %1 = arith.addi %0, %arg1 : i32
    %c0_i32 = arith.constant 0 : i32
    %c0_i32_0 = arith.constant 0 : i32
    return %1, %c0_i32 : i32, i32
  }
  func.func @transform_1(%arg0: i32, %arg1: i32) -> (i32, i32) {
    %c1_i32 = arith.constant 1 : i32
    %0 = arith.muli %arg0, %c1_i32 : i32
    %1 = arith.addi %0, %arg1 : i32
    %c0_i32 = arith.constant 0 : i32
    %c0_i32_0 = arith.constant 0 : i32
    return %1, %c0_i32 : i32, i32
  }
  func.func @transform_2(%arg0: i32, %arg1: i32) -> (i32, i32) {
    %c1_i32 = arith.constant 1 : i32
    %0 = arith.muli %arg0, %c1_i32 : i32
    %1 = arith.addi %0, %arg1 : i32
    %c0_i32 = arith.constant 0 : i32
    %c0_i32_0 = arith.constant 0 : i32
    return %1, %c0_i32 : i32, i32
  }
  func.func @transform_3(%arg0: i32, %arg1: i32) -> (i32, i32) {
    %c0_i32 = arith.constant 0 : i32
    %c0_i32_0 = arith.constant 0 : i32
    return %arg0, %c0_i32 : i32, i32
  }
}

</mosaic_0001>

<bundles_post_ra>
// kernel: tpu_custom_call.1
= control target key start
LH: loop header
LB: loop body
LE: loop exit
PB: predicated region body
PF: predicated region fallthrough
CT: control target
= control target key end

     0   :  { %8 = vsyncpa [#allocation4], 0  ;;  %s350_s0 = inlined_call_operand.hbm [shape: f32[16,128], index: 0, kind: input, shape index: {}]   ;;  %s351_s1 = inlined_call_operand.hbm [shape: f32[16,128], index: 1, kind: input, shape index: {}]   ;;  %s352_s2 = inlined_call_operand.hbm [shape: f32[16,128], index: 2, kind: input, shape index: {}]   ;;  %s353_s3 = inlined_call_operand.hbm [shape: f32[1,128], index: 3, kind: output, shape index: {}]  }
   0x1   :  { %9 = vsyncpa [#allocation7], 0 }
   0x2   :  { %10 = vsyncpa [#allocation5], 0  ;;  %s260_s12 = smov [#allocation6]   ;;  %s261_s14 = smov [#allocation3]  }
   0x3   :  { %s36_s13 = sshll.u32 %s260_s12, 4  ;;  %s20_s15 = sshll.u32 %s261_s14, 4  ;;  %s37_s13 = int_to_ptr.vmem [resolvable:$true] %s36_s13  ;;  %s286_s15 = int_to_ptr.vmem [resolvable:$true] %s20_s15 }
   0x4   :  { %s166_s18 = scalar_lea.hbm %s351_s1, 256 }
   0x5   :  { %p167_p0 = scmp.ne.s32.totalorder %s351_s1, %s166_s18  ;;  %p170_p1 = scmp.lt.u32.totalorder %s166_s18, %s351_s1 }
   0x7   :  { %p172_p2 = pnand %p170_p1, %p167_p0 }
   0x9   :  { %175 = shalt.err (!%p172_p2)
}
   0xa   :  { %s176_s23 = scalar_lea.vmem %s37_s13, 256  ;;  %p181_p4 = scmp.lt.s32.totalorder %s37_s13, %s37_s13 }
   0xb   :  { %p177_p3 = scmp.ne.s32.totalorder %s37_s13, %s176_s23  ;;  %p182_p5 = scmp.lt.s32.totalorder %s176_s23, %s176_s23 }
   0xd   :  { %p183_p6 = por %p182_p5, %p181_p4 }
   0xf   :  { %p184_p7 = pnand %p183_p6, %p177_p3 }
  0x11   :  { %187 = shalt.err (!%p184_p7)
}
  0x12   :  { %s262_s24 = smov 128   ;;  %s263_s25 = smov 8  }
  0x13   :  { %42 = dma.hbm_to_vmem [thread:$0]  %s351_s1, 256, %s37_s13, [#allocation7], %s262_s24, %s262_s24, %s263_s25  }
  0x14   :  { %s188_s30 = scalar_lea.hbm %s350_s0, 256 }
  0x15   :  { %p189_p8 = scmp.ne.s32.totalorder %s350_s0, %s188_s30  ;;  %p192_p9 = scmp.lt.u32.totalorder %s188_s30, %s350_s0 }
  0x17   :  { %p194_p10 = pnand %p192_p9, %p189_p8 }
  0x19   :  { %197 = shalt.err (!%p194_p10)
}
  0x1a   :  { %s198_s8 = scalar_lea.vmem %s286_s15, 256  ;;  %p203_p12 = scmp.lt.s32.totalorder %s286_s15, %s286_s15 }
  0x1b   :  { %p199_p11 = scmp.ne.s32.totalorder %s286_s15, %s198_s8  ;;  %p204_p13 = scmp.lt.s32.totalorder %s198_s8, %s198_s8 }
  0x1d   :  { %p205_p0 = por %p204_p13, %p203_p12 }
  0x1f   :  { %p206_p1 = pnand %p205_p0, %p199_p11 }
  0x21   :  { %209 = shalt.err (!%p206_p1)
}
  0x22   :  { %26 = dma.hbm_to_vmem [thread:$0]  %s350_s0, 256, %s286_s15, [#allocation4], %s262_s24, %s262_s24, %s263_s25  }
  0x23   :  { %s264_s10 = smov [#allocation8]   ;;  %s210_s14 = scalar_lea.hbm %s352_s2, 256 }
  0x24   :  { %s52_s11 = sshll.u32 %s264_s10, 4  ;;  %p211_p2 = scmp.ne.s32.totalorder %s352_s2, %s210_s14  ;;  %s53_s11 = int_to_ptr.vmem [resolvable:$true] %s52_s11 }
  0x25   :  { %p214_p3 = scmp.lt.u32.totalorder %s210_s14, %s352_s2 }
  0x27   :  { %p216_p4 = pnand %p214_p3, %p211_p2 }
  0x29   :  { %219 = shalt.err (!%p216_p4)
}
  0x2a   :  { %s220_s20 = scalar_lea.vmem %s53_s11, 256  ;;  %p225_p6 = scmp.lt.s32.totalorder %s53_s11, %s53_s11 }
  0x2b   :  { %p221_p5 = scmp.ne.s32.totalorder %s53_s11, %s220_s20  ;;  %p226_p7 = scmp.lt.s32.totalorder %s220_s20, %s220_s20 }
  0x2d   :  { %p227_p8 = por %p226_p7, %p225_p6 }
  0x2f   :  { %p228_p9 = pnand %p227_p8, %p221_p5 }
  0x31   :  { %231 = shalt.err (!%p228_p9)
}
  0x32   :  { %58 = dma.hbm_to_vmem [thread:$0]  %s352_s2, 256, %s53_s11, [#allocation7], %s262_s24, %s262_s24, %s263_s25  }
  0x33   :  { %254 = dma.done.wait [#allocation4], 256  }
  0x34   :  { %255 = vsyncadd [#allocation4], 4294967040 }
  0x35   :  { %256 = dma.done.wait [#allocation7], 512  }
  0x36   :  { %257 = vsyncadd [#allocation7], 4294966784  ;;  %v79_v0 = vld [vmem:[#allocation3] sm:$0xff]  ;;  %v80_v1 = vld [vmem:[#allocation3 + $0x8] sm:$0xff]  ;;  %s265_s2 = smov [#allocation9]  }
  0x37   :  { %158 = vlog2.f32 %v79_v0  ;;  %v91_v2 = vsub.f32 1.0, %v79_v0  ;;  %v92_v3 = vsub.f32 1.0, %v80_v1  ;;  %v81_v5 = vld [vmem:[#allocation6] sm:$0xff]  ;;  %v82_v7 = vld [vmem:[#allocation6 + $0x8] sm:$0xff]  ;;  %v83_v15 = vld [vmem:[#allocation8] sm:$0xff]  ;;  %s142_s21 = sshll.u32 %s265_s2, 4  ;;  %s143_s21 = int_to_ptr.vmem [resolvable:$true] %s142_s21 }
  0x38   :  { %160 = vlog2.f32 %v80_v1  ;;  %v101_v14 = vsub.f32 1.0, %v81_v5  ;;  %v102_v18 = vsub.f32 1.0, %v82_v7  ;;  %v84_v19 = vld [vmem:[#allocation8 + $0x8] sm:$0xff]  ;;  %v109_v22 = vsub.f32 %v79_v0, %v81_v5  ;;  %s232_s22 = scalar_lea.vmem %s143_s21, 16  ;;  %s236_s23 = scalar_lea.vmem %s143_s21, 32 }
  0x39   :  { %162 = vlog2.f32 %v91_v2  ;;  %v110_v25 = vsub.f32 %v80_v1, %v82_v7  ;;  %v115_v27 = vmul.f32 4.0, %v83_v15  ;;  %v116_v29 = vmul.f32 4.0, %v84_v19  ;;  %p233_p10 = scmp.ne.s32.totalorder %s143_s21, %s232_s22  ;;  %p237_p11 = scmp.lt.s32.totalorder %s143_s21, %s143_s21 }
  0x3a   :  { %164 = vlog2.f32 %v92_v3  ;;  %v111_v31 = vmul.f32 %v109_v22, %v109_v22  ;;  %p238_p12 = scmp.lt.s32.totalorder %s236_s23, %s232_s22 }
  0x3b   :  { %v112_v33 = vmul.f32 %v110_v25, %v110_v25  ;;  %v117_v35 = vadd.f32 1.0, %v115_v27  ;;  %v118_v37 = vadd.f32 1.0, %v116_v29 }
  0x3c   :  { %p239_p13 = por %p238_p12, %p237_p11 }
  0x3e   :  { %p240_p0 = pnand %p239_p13, %p233_p10 }
  0x41   :  { %v159_v4 = vpop.eup %158 }
  0x42   :  { %v161_v6 = vpop.eup %160  ;;  %v86_v8 = vmul.f32 0.6931472, %v159_v4 }
  0x43   :  { %v163_v9 = vpop.eup %162  ;;  %v88_v10 = vmul.f32 0.6931472, %v161_v6 }
  0x44   :  { %v165_v11 = vpop.eup %164  ;;  %v89_v12 = vmax.f32 %v86_v8, -100.0  ;;  %v94_v13 = vmul.f32 0.6931472, %v163_v9 }
  0x45   :  { %v90_v16 = vmax.f32 %v88_v10, -100.0  ;;  %v96_v17 = vmul.f32 0.6931472, %v165_v11 }
  0x46   :  { %v97_v20 = vmax.f32 %v94_v13, -100.0  ;;  %v99_v21 = vmul.f32 %v89_v12, %v81_v5 }
  0x47   :  { %v98_v23 = vmax.f32 %v96_v17, -100.0  ;;  %v100_v24 = vmul.f32 %v90_v16, %v82_v7 }
  0x48   :  { %v103_v26 = vmul.f32 %v101_v14, %v97_v20 }
  0x49   :  { %v104_v28 = vmul.f32 %v102_v18, %v98_v23 }
  0x4a   :  { %v105_v30 = vadd.f32 %v103_v26, %v99_v21 }
  0x4b   :  { %v106_v32 = vadd.f32 %v104_v28, %v100_v24 }
  0x4c   :  { %v107_v34 = vsub.f32 0.0, %v105_v30 }
  0x4d   :  { %v108_v36 = vsub.f32 0.0, %v106_v32 }
  0x4e   :  { %v113_v38 = vmul.f32 %v111_v31, %v107_v34 }
  0x4f   :  { %v114_v39 = vmul.f32 %v112_v33, %v108_v36 }
  0x50   :  { %v119_v40 = vmul.f32 %v117_v35, %v113_v38 }
  0x51   :  { %v120_v41 = vmul.f32 %v118_v37, %v114_v39 }
  0x53   :  { %v122_v42 = vadd.f32 %v120_v41, %v119_v40 }
  0x55   :  { %v129_v43 = vrot.slane %v122_v42, 4 }
  0x57   :  { %v130_v44 = vadd.f32 %v129_v43, %v122_v42 }
  0x59   :  { %v131_v45 = vrot.slane %v130_v44, 2 }
  0x5b   :  { %v132_v46 = vadd.f32 %v131_v45, %v130_v44 }
  0x5d   :  { %v133_v47 = vrot.slane %v132_v46, 1 }
  0x5f   :  { %v134_v48 = vadd.f32 %v133_v47, %v132_v46 }
  0x61   :  { %135 = vst [vmem:[#allocation9] sm:$0x1] %v134_v48 }
  0x62   :  { %243 = shalt.err (!%p240_p0)
}
  0x63   :  { %s244_s26 = scalar_lea.hbm %s353_s3, 16 }
  0x64   :  { %p245_p1 = scmp.ne.s32.totalorder %s353_s3, %s244_s26  ;;  %p248_p2 = scmp.lt.u32.totalorder %s244_s26, %s353_s3 }
  0x66   :  { %p250_p3 = pnand %p248_p2, %p245_p1 }
  0x68   :  { %253 = shalt.err (!%p250_p3)
}
  0x69   :  { %145 = dma.vmem_to_hbm [thread:$0]  %s143_s21, 16, %s353_s3, [#allocation5]  }
  0x6a   :  { %258 = dma.done.wait [#allocation5], 16  }
  0x6b   :  { %259 = vsyncadd [#allocation5], 4294967280 }
  0x6c   :  { %149 = vsyncpa [#allocation4], 1 }
  0x6d   :  { %150 = vsyncpa [#allocation7], 1 }
  0x6e   :  { %151 = vsyncpa [#allocation5], 1 }

</bundles_post_ra>
